<compile_context>
chip_gen: v7x
topology: tpu7x:2x2x1
jax: 0.10.0
libtpu: 0.0.40
codegen_flags: <defaults>
</compile_context>

<pallas_src>
import functools

import jax
import jax.numpy as jnp
from jax.experimental import pallas as pl
from jax.experimental.pallas import tpu as pltpu

# ---- constants from the PyTorch module ---------------------------------------
T_reduce = 1
timestep = 2.5
MAX_1 = T_reduce / timestep          # = 0.4

_LANE = 128                          # lane-dense output blocks -> unmasked stores
_SUBLANE = 8
_ROWS_TARGET = 1024                  # ~1 MiB / buffer at T=2 f32; far under VMEM


def _cdiv(a, b):
    return -(-a // b)


# ---------------------------- Pallas kernel -----------------------------------

def _make_mean_spike_kernel(t_in, t_out, thresh):
    """Fused: temporal mean -> replay T times -> IF integrate / fire / soft-reset."""
    inv_t = 1.0 / float(t_out)                      # torch.sum(x, dim=4) / self.T

    def kernel(x_ref, o_ref):
        # x_ref: (t_in, tm, 128)   o_ref: (t_out, tm, 128)   — all f32 in-register
        acc = x_ref[0]
        for t in range(1, t_in):                    # t_in tiny & static -> unrolled
            acc = acc + x_ref[t]
        drive = acc * inv_t                         # same drive at every output step
        # TODO(synk): catCuda.getSpikes source unavailable; assumed IF neuron with
        #             unit-amplitude spikes, fire at v >= thresh, soft reset (v -= thresh).
        v = jnp.zeros_like(drive)
        for t in range(t_out):
            v = v + drive
            s = (v >= thresh).astype(jnp.float32)
            o_ref[t] = s
            v = v - s * thresh

    return kernel


def _choose_row_tile(m_rows):
    """Largest convenient row tile; keep >= 2 grid steps so v7x can use both TCs."""
    if m_rows <= _SUBLANE:
        return _SUBLANE, 1
    steps = max(2, _cdiv(m_rows, _ROWS_TARGET))
    tm = _cdiv(m_rows, steps)
    tm = _cdiv(tm, _SUBLANE) * _SUBLANE
    return tm, _cdiv(m_rows, tm)


def mean_spike(x_tm, t_out, thresh):
    """x_tm: (Tin, M) float32 -> spikes (t_out, M) float32, fused in one kernel."""
    t_in, m = x_tm.shape
    m_rows = _cdiv(m, _LANE)
    tm, grid_m = _choose_row_tile(m_rows)
    m_rows_pad = tm * grid_m
    pad = m_rows_pad * _LANE - m
    if pad:
        x_tm = jnp.pad(x_tm, ((0, 0), (0, pad)))
    x3 = x_tm.reshape(t_in, m_rows_pad, _LANE)

    in_block = t_in * tm * _LANE * 4
    out_block = t_out * tm * _LANE * 4
    # double-buffered in + out blocks, plus headroom; always well under v7x's 64 MiB
    vmem_limit = max(8 << 20, min(48 << 20, 4 * (in_block + out_block) + (2 << 20)))

    out3 = pl.pallas_call(
        _make_mean_spike_kernel(t_in, t_out, float(thresh)),
        out_shape=jax.ShapeDtypeStruct((t_out, m_rows_pad, _LANE), jnp.float32),
        grid=(grid_m,),
        in_specs=[pl.BlockSpec((t_in, tm, _LANE), lambda i: (0, i, 0))],
        out_specs=pl.BlockSpec((t_out, tm, _LANE), lambda i: (0, i, 0)),
        compiler_params=pltpu.CompilerParams(
            dimension_semantics=("parallel",),
            vmem_limit_bytes=int(vmem_limit)),
    )(x3)

    out = out3.reshape(t_out, m_rows_pad * _LANE)
    if pad:
        out = out[:, :m]
    return out


# ---------------------------- module wrapper -----------------------------------

def new_spike_low_forward(x, T=T_reduce, threshold=1.0):
    """NewSpike_low.forward.  x: (N, C, H, W, Tin) -> (N, C, H, W, T) f32 spikes."""
    n, c, h, w, t_in = x.shape
    thresh = (MAX_1 - 0.001) / float(threshold)
    # time-major, flatten batch/channels/space; IF math stays f32 end-to-end
    xt = jnp.moveaxis(x, -1, 0).astype(jnp.float32).reshape(t_in, n * c * h * w)
    spikes = mean_spike(xt, T, thresh)
    return jnp.moveaxis(spikes.reshape(T, n, c, h, w), 0, -1)


# ---------------------------- pure-JAX reference --------------------------------

def new_spike_low_ref(x, T=T_reduce, threshold=1.0):
    m = jnp.sum(x.astype(jnp.float32), axis=4) / float(T)
    thresh = (MAX_1 - 0.001) / float(threshold)
    v = jnp.zeros_like(m)
    outs = []
    for _ in range(T):
        v = v + m
        s = (v >= thresh).astype(jnp.float32)
        outs.append(s)
        v = v - s * thresh
    return jnp.stack(outs, axis=-1)


if __name__ == "__main__":
    # Small shapes consistent with the module: 5-D (N, C, H, W, T) input.
    N, C, H, W, T = 2, 8, 16, 16, 2
    key = jax.random.PRNGKey(0)
    x = jax.random.uniform(key, (N, C, H, W, T), jnp.float32)

    fwd = jax.jit(functools.partial(new_spike_low_forward, T=T, threshold=1.0))
    out = jax.block_until_ready(fwd(x))

    assert out.shape == (N, C, H, W, T)
    assert bool(jnp.all(jnp.isfinite(out)))
    ref = new_spike_low_ref(x, T=T, threshold=1.0)
    assert float(jnp.mean(jnp.abs(out - ref))) < 1e-6
    print("KERNEL_OK")
</pallas_src>

<mosaic_0001>
module attributes {stable_mosaic.version = 11 : i64} {
  func.func @kernel(%arg0: i32, %arg1: memref<2x16x128xf32, #tpu.memory_space<vmem>>, %arg2: memref<2x16x128xf32, #tpu.memory_space<vmem>>) attributes {dimension_semantics = [#tpu.dimension_semantics<parallel>], iteration_bounds = array<i64: 2>, scalar_prefetch = 0 : i64, scratch_operands = 0 : i64, tpu.core_type = #tpu.core_type<tc>, window_params = [{transform_indices = @transform_0, window_bounds = array<i64: 2, 16, 128>}, {transform_indices = @transform_1, window_bounds = array<i64: 2, 16, 128>}]} {
    %c0 = arith.constant 0 : index
    %c0_0 = arith.constant 0 : index
    %c0_1 = arith.constant 0 : index
    %0 = vector.load %arg1[%c0, %c0_0, %c0_1] : memref<2x16x128xf32, #tpu.memory_space<vmem>>, vector<1x16x128xf32>
    %1 = vector.shape_cast %0 : vector<1x16x128xf32> to vector<16x128xf32>
    %c1 = arith.constant 1 : index
    %c0_2 = arith.constant 0 : index
    %c0_3 = arith.constant 0 : index
    %2 = vector.load %arg1[%c1, %c0_2, %c0_3] : memref<2x16x128xf32, #tpu.memory_space<vmem>>, vector<1x16x128xf32>
    %3 = vector.shape_cast %2 : vector<1x16x128xf32> to vector<16x128xf32>
    %4 = arith.addf %1, %3 : vector<16x128xf32>
    %cst = arith.constant 5.000000e-01 : f32
    %5 = vector.broadcast %cst : f32 to vector<16x128xf32>
    %6 = arith.mulf %4, %5 : vector<16x128xf32>
    %cst_4 = arith.constant 0.000000e+00 : f32
    %7 = vector.broadcast %cst_4 : f32 to vector<16x128xf32>
    %8 = arith.addf %7, %6 : vector<16x128xf32>
    %cst_5 = arith.constant 3.990000e-01 : f32
    %9 = vector.broadcast %cst_5 : f32 to vector<16x128xf32>
    %10 = arith.cmpf oge, %8, %9 : vector<16x128xf32>
    %11 = arith.extui %10 : vector<16x128xi1> to vector<16x128xi32>
    %12 = arith.sitofp %11 : vector<16x128xi32> to vector<16x128xf32>
    %c0_6 = arith.constant 0 : index
    %c0_7 = arith.constant 0 : index
    %c0_8 = arith.constant 0 : index
    %13 = vector.load %arg2[%c0_6, %c0_7, %c0_8] : memref<2x16x128xf32, #tpu.memory_space<vmem>>, vector<1x16x128xf32>
    %14 = vector.shape_cast %13 : vector<1x16x128xf32> to vector<16x128xf32>
    %15 = vector.shape_cast %12 : vector<16x128xf32> to vector<1x16x128xf32>
    tpu.vector_store %arg2[%c0_6, %c0_7, %c0_8], %15 {strides = array<i32>} : memref<2x16x128xf32, #tpu.memory_space<vmem>>, vector<1x16x128xf32>,
    %cst_9 = arith.constant 3.990000e-01 : f32
    %16 = vector.broadcast %cst_9 : f32 to vector<16x128xf32>
    %17 = arith.mulf %12, %16 : vector<16x128xf32>
    %18 = arith.subf %8, %17 : vector<16x128xf32>
    %19 = arith.addf %18, %6 : vector<16x128xf32>
    %cst_10 = arith.constant 3.990000e-01 : f32
    %20 = vector.broadcast %cst_10 : f32 to vector<16x128xf32>
    %21 = arith.cmpf oge, %19, %20 : vector<16x128xf32>
    %22 = arith.extui %21 : vector<16x128xi1> to vector<16x128xi32>
    %23 = arith.sitofp %22 : vector<16x128xi32> to vector<16x128xf32>
    %c1_11 = arith.constant 1 : index
    %c0_12 = arith.constant 0 : index
    %c0_13 = arith.constant 0 : index
    %24 = vector.load %arg2[%c1_11, %c0_12, %c0_13] : memref<2x16x128xf32, #tpu.memory_space<vmem>>, vector<1x16x128xf32>
    %25 = vector.shape_cast %24 : vector<1x16x128xf32> to vector<16x128xf32>
    %26 = vector.shape_cast %23 : vector<16x128xf32> to vector<1x16x128xf32>
    tpu.vector_store %arg2[%c1_11, %c0_12, %c0_13], %26 {strides = array<i32>} : memref<2x16x128xf32, #tpu.memory_space<vmem>>, vector<1x16x128xf32>,
    return
  }
  func.func @transform_0(%arg0: i32) -> (i32, i32, i32) {
    %c0_i32 = arith.constant 0 : i32
    %c0_i32_0 = arith.constant 0 : i32
    %c0_i32_1 = arith.constant 0 : i32
    return %c0_i32, %arg0, %c0_i32_0 : i32, i32, i32
  }
  func.func @transform_1(%arg0: i32) -> (i32, i32, i32) {
    %c0_i32 = arith.constant 0 : i32
    %c0_i32_0 = arith.constant 0 : i32
    %c0_i32_1 = arith.constant 0 : i32
    return %c0_i32, %arg0, %c0_i32_0 : i32, i32, i32
  }
}

</mosaic_0001>

<bundles_post_ra>
// kernel: new_spike_low_forward.1
= control target key start
LH: loop header
LB: loop body
LE: loop exit
PB: predicated region body
PF: predicated region fallthrough
CT: control target
= control target key end

     0   :  { %s389_s6 = smov 0   ;;  %s391_s7 = smov 0   ;;  %s449_s0 = inlined_call_operand.vmem [shape: f32[2,32,128], index: 0, kind: input, shape index: {}]   ;;  %s450_s1 = inlined_call_operand.vmem [shape: f32[2,32,128], index: 1, kind: output, shape index: {}]  }
   0x1   :  { %s393_s8 = smov 0  }
   0x2 LB: > { %s304_s9 = sadd.s32 4294967295, %s376_s8   ;;  %s406_s10 = sadd.s32 1, %s376_s8   ;;  %s376_s8 = sphi %s393_s8, %s454_s8   ;;  %s372_s7 = sphi %s391_s7, %s453_s7   ;;  %s368_s6 = sphi %s389_s6, %s452_s6  }
   0x3   : > { %s15_s11 = ssub.s32 %s376_s8, %s406_s10  ;;  %s18_s12 = sadd.s32 1, %s372_s7 }
   0x4   : > { %p16_p0 = scmp.eq.s32.totalorder %s15_s11, 0  ;;  %p25_p1 = scmp.ne.s32.totalorder %s372_s7, %s368_s6 }
   0x5   : > { %p26_p2 = scmp.eq.s32.totalorder %s376_s8, 0  ;;  %p55_p3 = scmp.eq.s32.totalorder %s304_s9, 1 }
   0x6   : > { %s417_s13 = scalar_select %p16_p0, %s372_s7, %s18_s12  }
   0x7   : > { %p27_p4 = por %p26_p2, %p25_p1  ;;  %p419_p5 = por %p55_p3, %p25_p1 }
   0x8   : > { %p307_p6 = scmp.ge.s32.totalorder %s376_s8, 2 }
   0xa   : > { %77 = sbr.rel (%p307_p6) target bundleno = 24 (0x18), region = 16 }
  0x11   : > { %80 = sbr.rel (!%p27_p4) target bundleno = 24 (0x18), region = 20  ;;  %s82_s15 = sand.u32 (%p27_p4), 1, %s372_s7  }
  0x12   : > { %s327_s16 = sshll.u32 (%p27_p4), %s376_s8, 4  ;;  %s308_s17 = sshll.u32 (%p27_p4), %s82_s15, 5 }
  0x13   : > { %s87_s20 = scalar_lea.vmem (%p27_p4), %s449_s0, %s327_s16  ;;  %s84_s21 = scalar_lea.vmem (%p27_p4), [#allocation2], %s308_s17 }
  0x14   : > { %v121_v0 = vld [vmem:[%s87_s20] sm:$0xff] (%p27_p4)  ;;  %v123_v1 = vld [vmem:[%s87_s20 + $0x8] sm:$0xff] (%p27_p4) }
  0x15   : > { %v125_v2 = vld [vmem:[%s87_s20 + $0x20] sm:$0xff] (%p27_p4)  ;;  %122 = vst [vmem:[%s84_s21] sm:$0xff] (%p27_p4), %v121_v0  ;;  %124 = vst [vmem:[%s84_s21 + $0x8] sm:$0xff] (%p27_p4), %v123_v1  ;;  %v127_v3 = vld [vmem:[%s87_s20 + $0x28] sm:$0xff] (%p27_p4) }
  0x16   : > { %126 = vst [vmem:[%s84_s21 + $0x10] sm:$0xff] (%p27_p4), %v125_v2  ;;  %128 = vst [vmem:[%s84_s21 + $0x18] sm:$0xff] (%p27_p4), %v127_v3 }
  0x18 PF: > { %p311_p7 = scmp.ge.s32.totalorder %s376_s8, 1  ;;  %p133_p8 = scmp.lt.s32.totalorder %s376_s8, 3 }
  0x1a   : > { %p134_p9 = pnand %p311_p7, %p133_p8 }
  0x1b   : > { %s140_s22 = sand.u32 (!%p134_p9), 1, %s368_s6   ;;  %v378_v12 = vmov (!%p134_p9), 0.0  }
  0x1c   : > { %137 = sbr.rel (%p134_p9) target bundleno = 55 (0x37), region = 58  ;;  %s312_s23 = sshll.u32 (!%p134_p9), %s140_s22, 5 }
  0x1d   : > { %s142_s24 = scalar_lea.vmem (!%p134_p9), [#allocation2], %s312_s23  ;;  %s157_s25 = scalar_lea.vmem (!%p134_p9), [#allocation3], %s312_s23 }
  0x1e   : > { %v160_v4 = vld [vmem:[%s142_s24] sm:$0xff] (!%p134_p9)  ;;  %v314_v5 = vld [vmem:[%s142_s24 + $0x10] sm:$0xff] (!%p134_p9)  ;;  %v161_v6 = vld [vmem:[%s142_s24 + $0x8] sm:$0xff] (!%p134_p9) }
  0x1f   : > { %v165_v7 = vadd.f32 (!%p134_p9), %v314_v5, %v160_v4  ;;  %v315_v8 = vld [vmem:[%s142_s24 + $0x18] sm:$0xff] (!%p134_p9) }
  0x20   : > { %v166_v9 = vadd.f32 (!%p134_p9), %v315_v8, %v161_v6 }
  0x21   : > { %v167_v10 = vmul.f32 (!%p134_p9), 0.5, %v165_v7 }
  0x22   : > { %v168_v11 = vmul.f32 (!%p134_p9), 0.5, %v166_v9 }
  0x23   : > { %vm171_vm0 = vcmp.ge.f32.partialorder %v167_v10, 0.399  ;;  %s328_s26 = sshll.u32 (%p419_p5), %s304_s9, 4 }
  0x24   : > { %v316_v13 = vsel %vm171_vm0, 1.0, %v378_v12  ;;  %vm172_vm1 = vcmp.ge.f32.partialorder %v168_v11, 0.399  ;;  %s203_s29 = scalar_lea.vmem (%p419_p5), %s450_s1, %s328_s26 }
  0x25   : > { %177 = vst [vmem:[%s157_s25] sm:$0xff] %v316_v13  ;;  %v179_v14 = vmul.f32 0.399, %v316_v13  ;;  %v317_v15 = vsel %vm172_vm1, 1.0, %v378_v12 }
  0x26   : > { %178 = vst [vmem:[%s157_s25 + $0x8] sm:$0xff] %v317_v15  ;;  %v180_v16 = vmul.f32 0.399, %v317_v15 }
  0x27   : > { %v181_v17 = vsub.f32 %v167_v10, %v179_v14 }
  0x28   : > { %v182_v18 = vsub.f32 %v168_v11, %v180_v16  ;;  %200 = sbr.rel (!%p419_p5) target bundleno = 55 (0x37), region = 66 }
  0x29   : > { %v183_v19 = vadd.f32 %v181_v17, %v167_v10 }
  0x2a   : > { %v184_v20 = vadd.f32 %v182_v18, %v168_v11 }
  0x2b   : > { %vm185_vm2 = vcmp.ge.f32.partialorder %v183_v19, 0.399 }
  0x2c   : > { %v318_v21 = vsel %vm185_vm2, 1.0, %v378_v12  ;;  %vm186_vm3 = vcmp.ge.f32.partialorder %v184_v20, 0.399  ;;  %v237_v23 = vld [vmem:[%s157_s25] sm:$0xff] (%p419_p5) }
  0x2d   : > { %320 = vst [vmem:[%s157_s25 + $0x10] sm:$0xff] %v318_v21  ;;  %v319_v22 = vsel %vm186_vm3, 1.0, %v378_v12  ;;  %v239_v24 = vld [vmem:[%s157_s25 + $0x8] sm:$0xff] (%p419_p5)  ;;  %238 = vst [vmem:[%s203_s29] sm:$0xff] (%p419_p5), %v237_v23 }
  0x2e   : > { %321 = vst [vmem:[%s157_s25 + $0x18] sm:$0xff] %v319_v22  ;;  %240 = vst [vmem:[%s203_s29 + $0x8] sm:$0xff] (%p419_p5), %v239_v24 }
  0x34   : > { %v241_v25 = vld [vmem:[%s157_s25 + $0x10] sm:$0xff] }
  0x35   : > { %v243_v26 = vld [vmem:[%s157_s25 + $0x18] sm:$0xff]  ;;  %242 = vst [vmem:[%s203_s29 + $0x20] sm:$0xff] %v241_v25 }
  0x36   : > { %244 = vst [vmem:[%s203_s29 + $0x28] sm:$0xff] %v243_v26 }
  0x37 PF: > { %p8_p10 = scmp.ge.s32.totalorder %s406_s10, 4   ;;  %s452_s6 = smov %s372_s7 }
  0x38   : > { %s453_s7 = smov %s417_s13  ;;  %s454_s8 = smov %s406_s10 }
  0x39   :  { %10 = sbr.rel (!%p8_p10) target bundleno = 2 (0x2), region = 137 }

</bundles_post_ra>
